<compile_context>
chip_gen: v6e
topology: v6e:2x2x1
jax: 0.10.0
libtpu: 0.0.40
codegen_flags: <defaults>
</compile_context>

<pallas_src>
import functools

import jax
import jax.numpy as jnp
from jax.experimental import pallas as pl
from jax.experimental.pallas import tpu as pltpu

# ---- static head layout -----------------------------------------------------
REG_TASKS = ["rating", "review_count", "weight", "price"]            # 1 col each
CLS_TASKS = [("brand", 2), ("size", 2), ("color", 4),
             ("material", 3), ("category", 4)]
N_REG = len(REG_TASKS)                                               # 4
N_CLS = sum(n for _, n in CLS_TASKS)                                 # 15
N_OUT = N_REG + N_CLS                                                # 19

# (start, size) of each classification group inside the 15-col slab
_slices = []
_off = 0
for _, _n in CLS_TASKS:
    _slices.append((_off, _n))
    _off += _n
GROUP_SLICES = tuple(_slices)

ALIGN = 16                       # sublane alignment safe for bf16 (16) and f32 (8)
VMEM_BUDGET = 24 * 1024 * 1024   # v7x-safe (32 MiB scoped default, 64 MiB physical)


def _round_up(x, m):
    return ((x + m - 1) // m) * m


def _pick_tile(b, d, tile_cap):
    """Pick a batch tile: large (amortize step overhead), VMEM-budgeted,
    and split so the grid has >=2 steps when the batch allows (v7x megacore)."""
    b_al = _round_up(b, ALIGN)

    # Per-row VMEM: bf16 x double-buffered + f32 out double-buffered + f32
    # intermediates (h1, h2, logits, exp slab, merged row).
    bytes_per_row = (2 * 2 * d) + (2 * 4 * N_OUT) + 4 * (64 + 32 + 2 * N_OUT + N_CLS)
    # Resident weights (double-buffered allocations, constant index maps).
    weight_bytes = 2 * (d * 64 * 2 + 64 * 32 * 2 + 32 * N_OUT * 2
                        + (64 + 32 + N_OUT) * 4)
    budget = max(VMEM_BUDGET - weight_bytes, ALIGN * bytes_per_row)
    vmem_tile = max(ALIGN, (budget // bytes_per_row) // ALIGN * ALIGN)

    tile = min(_round_up(tile_cap, ALIGN), vmem_tile, b_al)

    # Megacore: ensure at least 2 grid steps when the batch is big enough.
    if b_al >= 2 * ALIGN and _round_up(b_al, tile) // tile < 2:
        tile = min(tile, _round_up((b_al + 1) // 2, ALIGN))
    return tile


# ---- kernel ------------------------------------------------------------------
def _multitask_kernel(x_ref, w1_ref, b1_ref, w2_ref, b2_ref, wh_ref, bh_ref,
                      out_ref):
    """One batch tile: shared MLP -> fused head matmul -> grouped softmax."""
    x = x_ref[...]                                                    # (T, D) bf16

    # shared layers: Linear(D,64)+ReLU, Linear(64,32)+ReLU  (bf16 MXU, f32 acc)
    h1 = jnp.maximum(
        jnp.dot(x, w1_ref[...], preferred_element_type=jnp.float32) + b1_ref[...],
        0.0)
    h2 = jnp.maximum(
        jnp.dot(h1.astype(jnp.bfloat16), w2_ref[...],
                preferred_element_type=jnp.float32) + b2_ref[...],
        0.0)

    # fused heads: (T, 32) @ (32, 19) + (1, 19)
    logits = (jnp.dot(h2.astype(jnp.bfloat16), wh_ref[...],
                      preferred_element_type=jnp.float32) + bh_ref[...])

    # grouped softmax over the 15 classification columns (per-group max for
    # stability), merged with the regression columns into one row store.
    pieces = [logits[:, :N_REG]]
    for s, n in GROUP_SLICES:
        g = logits[:, N_REG + s:N_REG + s + n]
        e = jnp.exp(g - jnp.max(g, axis=-1, keepdims=True))
        inv = pl.reciprocal(jnp.sum(e, axis=-1, keepdims=True), approx=False)
        pieces.append(e * inv)
    out_ref[...] = jnp.concatenate(pieces, axis=-1)                   # single store


# ---- wrapper -----------------------------------------------------------------
@functools.partial(jax.jit, static_argnames=("tile_b",))
def multitask_forward(x, params, *, tile_b=8192):
    b, d = x.shape
    tile = _pick_tile(b, d, tile_b)
    padded_b = _round_up(b, tile)

    xb = x.astype(jnp.bfloat16)                       # halve the dominant HBM read
    if padded_b != b:
        xb = jnp.pad(xb, ((0, padded_b - b), (0, 0)))

    w1 = params["w1"].astype(jnp.bfloat16)
    w2 = params["w2"].astype(jnp.bfloat16)
    wh = params["wh"].astype(jnp.bfloat16)

    grid = (padded_b // tile,)

    out = pl.pallas_call(
        _multitask_kernel,
        out_shape=jax.ShapeDtypeStruct((padded_b, N_OUT), jnp.float32),
        grid=grid,
        in_specs=[
            pl.BlockSpec((tile, d), lambda i: (i, 0)),       # x tile (pipelined)
            pl.BlockSpec((d, 64), lambda i: (0, 0)),         # w1 (resident)
            pl.BlockSpec((1, 64), lambda i: (0, 0)),         # b1
            pl.BlockSpec((64, 32), lambda i: (0, 0)),        # w2
            pl.BlockSpec((1, 32), lambda i: (0, 0)),         # b2
            pl.BlockSpec((32, N_OUT), lambda i: (0, 0)),     # fused head W
            pl.BlockSpec((1, N_OUT), lambda i: (0, 0)),      # fused head b
        ],
        out_specs=pl.BlockSpec((tile, N_OUT), lambda i: (i, 0)),
        compiler_params=pltpu.CompilerParams(
            dimension_semantics=("parallel",),               # megacore on v7x
        ),
    )(xb, w1, params["b1"], w2, params["b2"], wh, params["bh"])

    out = out[:b]                                            # drop padded rows

    # slice fused output back into the PyTorch-style task dict
    result = {}
    for i, task in enumerate(REG_TASKS):
        result[task] = out[:, i:i + 1]                       # (B, 1)
    off = N_REG
    for task, n in CLS_TASKS:
        result[task] = out[:, off:off + n]                   # (B, n)
        off += n
    return result


# ---- params / references -------------------------------------------------------
def init_params(key, input_size):
    """Deterministic nn.Linear-style init (uniform +-1/sqrt(fan_in))."""
    def linear(k, fan_in, fan_out):
        kw, kb = jax.random.split(k)
        bound = 1.0 / jnp.sqrt(fan_in)
        w = jax.random.uniform(kw, (fan_in, fan_out), jnp.float32, -bound, bound)
        b = jax.random.uniform(kb, (1, fan_out), jnp.float32, -bound, bound)
        return w, b

    keys = jax.random.split(key, 2 + N_REG + len(CLS_TASKS))
    w1, b1 = linear(keys[0], input_size, 64)
    w2, b2 = linear(keys[1], 64, 32)

    head_ws, head_bs = [], []
    ki = 2
    for _ in REG_TASKS:
        w, bb = linear(keys[ki], 32, 1); ki += 1
        head_ws.append(w); head_bs.append(bb)
    for _, n in CLS_TASKS:
        w, bb = linear(keys[ki], 32, n); ki += 1
        head_ws.append(w); head_bs.append(bb)
    wh = jnp.concatenate(head_ws, axis=1)   # (32, 19)
    bh = jnp.concatenate(head_bs, axis=1)   # (1, 19)

    return {"w1": w1, "b1": b1, "w2": w2, "b2": b2, "wh": wh, "bh": bh}


def _split_heads(logits, softmax):
    ref = {}
    for i, task in enumerate(REG_TASKS):
        ref[task] = logits[:, i:i + 1]
    off = N_REG
    for task, n in CLS_TASKS:
        blk = logits[:, off:off + n]
        ref[task] = jax.nn.softmax(blk, axis=-1) if softmax else blk
        off += n
    return ref


def _reference_f32(x, params):
    """Pure f32 reference (matches the PyTorch module exactly)."""
    h1 = jnp.maximum(x @ params["w1"] + params["b1"], 0.0)
    h2 = jnp.maximum(h1 @ params["w2"] + params["b2"], 0.0)
    logits = h2 @ params["wh"] + params["bh"]
    return _split_heads(logits, softmax=True)


def _reference_bf16(x, params):
    """Reference with the same bf16 operand / f32 accumulate casts as the kernel."""
    w1 = params["w1"].astype(jnp.bfloat16)
    w2 = params["w2"].astype(jnp.bfloat16)
    wh = params["wh"].astype(jnp.bfloat16)
    h1 = jnp.maximum(
        jnp.dot(x.astype(jnp.bfloat16), w1, preferred_element_type=jnp.float32)
        + params["b1"], 0.0)
    h2 = jnp.maximum(
        jnp.dot(h1.astype(jnp.bfloat16), w2, preferred_element_type=jnp.float32)
        + params["b2"], 0.0)
    logits = (jnp.dot(h2.astype(jnp.bfloat16), wh, preferred_element_type=jnp.float32)
              + params["bh"])
    return _split_heads(logits, softmax=True)


def _check(out, ref, tol):
    for task in ref:
        assert out[task].shape == ref[task].shape, task
        err = float(jnp.max(jnp.abs(out[task] - ref[task])))
        assert err < tol, (task, err, tol)


if __name__ == "__main__":
    key = jax.random.PRNGKey(0)
    k_x, k_x2, k_p = jax.random.split(key, 3)

    input_size = 32
    params = init_params(k_p, input_size)

    # small batch (single grid step, padded 8 -> 16 rows)
    x_small = jax.random.normal(k_x, (8, input_size), jnp.float32)
    out_small = multitask_forward(x_small, params)
    out_small = jax.tree_util.tree_map(jax.block_until_ready, out_small)
    _check(out_small, _reference_bf16(x_small, params), tol=3e-3)
    _check(out_small, _reference_f32(x_small, params), tol=1e-1)

    # non-multiple batch, default tile: exercises megacore split (grid=2) + padding
    x_big = jax.random.normal(k_x2, (200, input_size), jnp.float32)
    out_big = multitask_forward(x_big, params)
    out_big = jax.tree_util.tree_map(jax.block_until_ready, out_big)
    _check(out_big, _reference_bf16(x_big, params), tol=3e-3)
    _check(out_big, _reference_f32(x_big, params), tol=1e-1)

    # small explicit tile: exercises grid > 2 with the same data
    out_big2 = multitask_forward(x_big, params, tile_b=64)
    out_big2 = jax.tree_util.tree_map(jax.block_until_ready, out_big2)
    _check(out_big2, _reference_bf16(x_big, params), tol=3e-3)

    print("KERNEL_OK")
</pallas_src>

<mosaic_0001>
module attributes {stable_mosaic.version = 11 : i64} {
  func.func @_multitask_kernel(%arg0: i32, %arg1: memref<16x32xbf16, #tpu.memory_space<vmem>>, %arg2: memref<32x64xbf16, #tpu.memory_space<vmem>>, %arg3: memref<1x64xf32, #tpu.memory_space<vmem>>, %arg4: memref<64x32xbf16, #tpu.memory_space<vmem>>, %arg5: memref<1x32xf32, #tpu.memory_space<vmem>>, %arg6: memref<32x19xbf16, #tpu.memory_space<vmem>>, %arg7: memref<1x19xf32, #tpu.memory_space<vmem>>, %arg8: memref<16x19xf32, #tpu.memory_space<vmem>>) attributes {dimension_semantics = [#tpu.dimension_semantics<parallel>], iteration_bounds = array<i64: 1>, scalar_prefetch = 0 : i64, scratch_operands = 0 : i64, tpu.core_type = #tpu.core_type<tc>, window_params = [{transform_indices = @transform_0, window_bounds = array<i64: 16, 32>}, {pipeline_mode = #tpu.pipeline_mode<synchronous>, transform_indices = @transform_1, window_bounds = array<i64: 32, 64>}, {pipeline_mode = #tpu.pipeline_mode<synchronous>, transform_indices = @transform_2, window_bounds = array<i64: 1, 64>}, {pipeline_mode = #tpu.pipeline_mode<synchronous>, transform_indices = @transform_3, window_bounds = array<i64: 64, 32>}, {pipeline_mode = #tpu.pipeline_mode<synchronous>, transform_indices = @transform_4, window_bounds = array<i64: 1, 32>}, {pipeline_mode = #tpu.pipeline_mode<synchronous>, transform_indices = @transform_5, window_bounds = array<i64: 32, 19>}, {pipeline_mode = #tpu.pipeline_mode<synchronous>, transform_indices = @transform_6, window_bounds = array<i64: 1, 19>}, {transform_indices = @transform_7, window_bounds = array<i64: 16, 19>}]} {
    %c0 = arith.constant 0 : index
    %c0_0 = arith.constant 0 : index
    %0 = vector.load %arg1[%c0, %c0_0] : memref<16x32xbf16, #tpu.memory_space<vmem>>, vector<16x32xbf16>
    %c0_1 = arith.constant 0 : index
    %c0_2 = arith.constant 0 : index
    %1 = vector.load %arg2[%c0_1, %c0_2] : memref<32x64xbf16, #tpu.memory_space<vmem>>, vector<32x64xbf16>
    %cst = arith.constant dense<0.000000e+00> : vector<16x64xf32>
    %2 = tpu.matmul %0, %1, %cst {dimension_numbers = #tpu.dot_dimension_numbers<[1], [0], [0], [1], [0, 0, 1, 1], [], []>} : vector<16x32xbf16>, vector<32x64xbf16>, vector<16x64xf32> -> vector<16x64xf32>
    %c0_3 = arith.constant 0 : index
    %c0_4 = arith.constant 0 : index
    %3 = vector.load %arg3[%c0_3, %c0_4] : memref<1x64xf32, #tpu.memory_space<vmem>>, vector<1x64xf32>
    %4 = vector.broadcast %3 : vector<1x64xf32> to vector<16x64xf32>
    %5 = arith.addf %2, %4 : vector<16x64xf32>
    %cst_5 = arith.constant 0.000000e+00 : f32
    %6 = vector.broadcast %cst_5 : f32 to vector<16x64xf32>
    %7 = arith.maximumf %5, %6 : vector<16x64xf32>
    %8 = arith.truncf %7 : vector<16x64xf32> to vector<16x64xbf16>
    %c0_6 = arith.constant 0 : index
    %c0_7 = arith.constant 0 : index
    %9 = vector.load %arg4[%c0_6, %c0_7] : memref<64x32xbf16, #tpu.memory_space<vmem>>, vector<64x32xbf16>
    %cst_8 = arith.constant dense<0.000000e+00> : vector<16x32xf32>
    %10 = tpu.matmul %8, %9, %cst_8 {dimension_numbers = #tpu.dot_dimension_numbers<[1], [0], [0], [1], [0, 0, 1, 1], [], []>} : vector<16x64xbf16>, vector<64x32xbf16>, vector<16x32xf32> -> vector<16x32xf32>
    %c0_9 = arith.constant 0 : index
    %c0_10 = arith.constant 0 : index
    %11 = vector.load %arg5[%c0_9, %c0_10] : memref<1x32xf32, #tpu.memory_space<vmem>>, vector<1x32xf32>
    %12 = vector.broadcast %11 : vector<1x32xf32> to vector<16x32xf32>
    %13 = arith.addf %10, %12 : vector<16x32xf32>
    %cst_11 = arith.constant 0.000000e+00 : f32
    %14 = vector.broadcast %cst_11 : f32 to vector<16x32xf32>
    %15 = arith.maximumf %13, %14 : vector<16x32xf32>
    %16 = arith.truncf %15 : vector<16x32xf32> to vector<16x32xbf16>
    %c0_12 = arith.constant 0 : index
    %c0_13 = arith.constant 0 : index
    %17 = vector.load %arg6[%c0_12, %c0_13] : memref<32x19xbf16, #tpu.memory_space<vmem>>, vector<32x19xbf16>
    %cst_14 = arith.constant dense<0.000000e+00> : vector<16x19xf32>
    %18 = tpu.matmul %16, %17, %cst_14 {dimension_numbers = #tpu.dot_dimension_numbers<[1], [0], [0], [1], [0, 0, 1, 1], [], []>} : vector<16x32xbf16>, vector<32x19xbf16>, vector<16x19xf32> -> vector<16x19xf32>
    %c0_15 = arith.constant 0 : index
    %c0_16 = arith.constant 0 : index
    %19 = vector.load %arg7[%c0_15, %c0_16] : memref<1x19xf32, #tpu.memory_space<vmem>>, vector<1x19xf32>
    %20 = vector.broadcast %19 : vector<1x19xf32> to vector<16x19xf32>
    %21 = arith.addf %18, %20 : vector<16x19xf32>
    %22 = vector.extract_strided_slice %21 {offsets = [0, 0], sizes = [16, 4], strides = [1, 1]} : vector<16x19xf32> to vector<16x4xf32>
    %23 = vector.extract_strided_slice %21 {offsets = [0, 4], sizes = [16, 2], strides = [1, 1]} : vector<16x19xf32> to vector<16x2xf32>
    %cst_17 = arith.constant dense<0xFF800000> : vector<16xf32>
    %24 = vector.multi_reduction <maximumf>, %23, %cst_17 [1] : vector<16x2xf32> to vector<16xf32>
    %25 = vector.shape_cast %24 : vector<16xf32> to vector<16x1xf32>
    %26 = vector.broadcast %25 : vector<16x1xf32> to vector<16x2xf32>
    %27 = arith.subf %23, %26 : vector<16x2xf32>
    %28 = math.exp %27 : vector<16x2xf32>
    %cst_18 = arith.constant dense<0.000000e+00> : vector<16xf32>
    %29 = vector.multi_reduction <add>, %28, %cst_18 [1] : vector<16x2xf32> to vector<16xf32>
    %30 = vector.shape_cast %29 : vector<16xf32> to vector<16x1xf32>
    %31 = tpu.reciprocal %30 : vector<16x1xf32> -> vector<16x1xf32>
    %32 = vector.broadcast %31 : vector<16x1xf32> to vector<16x2xf32>
    %33 = arith.mulf %28, %32 : vector<16x2xf32>
    %34 = vector.extract_strided_slice %21 {offsets = [0, 6], sizes = [16, 2], strides = [1, 1]} : vector<16x19xf32> to vector<16x2xf32>
    %cst_19 = arith.constant dense<0xFF800000> : vector<16xf32>
    %35 = vector.multi_reduction <maximumf>, %34, %cst_19 [1] : vector<16x2xf32> to vector<16xf32>
    %36 = vector.shape_cast %35 : vector<16xf32> to vector<16x1xf32>
    %37 = vector.broadcast %36 : vector<16x1xf32> to vector<16x2xf32>
    %38 = arith.subf %34, %37 : vector<16x2xf32>
    %39 = math.exp %38 : vector<16x2xf32>
    %cst_20 = arith.constant dense<0.000000e+00> : vector<16xf32>
    %40 = vector.multi_reduction <add>, %39, %cst_20 [1] : vector<16x2xf32> to vector<16xf32>
    %41 = vector.shape_cast %40 : vector<16xf32> to vector<16x1xf32>
    %42 = tpu.reciprocal %41 : vector<16x1xf32> -> vector<16x1xf32>
    %43 = vector.broadcast %42 : vector<16x1xf32> to vector<16x2xf32>
    %44 = arith.mulf %39, %43 : vector<16x2xf32>
    %45 = vector.extract_strided_slice %21 {offsets = [0, 8], sizes = [16, 4], strides = [1, 1]} : vector<16x19xf32> to vector<16x4xf32>
    %cst_21 = arith.constant dense<0xFF800000> : vector<16xf32>
    %46 = vector.multi_reduction <maximumf>, %45, %cst_21 [1] : vector<16x4xf32> to vector<16xf32>
    %47 = vector.shape_cast %46 : vector<16xf32> to vector<16x1xf32>
    %48 = vector.broadcast %47 : vector<16x1xf32> to vector<16x4xf32>
    %49 = arith.subf %45, %48 : vector<16x4xf32>
    %50 = math.exp %49 : vector<16x4xf32>
    %cst_22 = arith.constant dense<0.000000e+00> : vector<16xf32>
    %51 = vector.multi_reduction <add>, %50, %cst_22 [1] : vector<16x4xf32> to vector<16xf32>
    %52 = vector.shape_cast %51 : vector<16xf32> to vector<16x1xf32>
    %53 = tpu.reciprocal %52 : vector<16x1xf32> -> vector<16x1xf32>
    %54 = vector.broadcast %53 : vector<16x1xf32> to vector<16x4xf32>
    %55 = arith.mulf %50, %54 : vector<16x4xf32>
    %56 = vector.extract_strided_slice %21 {offsets = [0, 12], sizes = [16, 3], strides = [1, 1]} : vector<16x19xf32> to vector<16x3xf32>
    %cst_23 = arith.constant dense<0xFF800000> : vector<16xf32>
    %57 = vector.multi_reduction <maximumf>, %56, %cst_23 [1] : vector<16x3xf32> to vector<16xf32>
    %58 = vector.shape_cast %57 : vector<16xf32> to vector<16x1xf32>
    %59 = vector.broadcast %58 : vector<16x1xf32> to vector<16x3xf32>
    %60 = arith.subf %56, %59 : vector<16x3xf32>
    %61 = math.exp %60 : vector<16x3xf32>
    %cst_24 = arith.constant dense<0.000000e+00> : vector<16xf32>
    %62 = vector.multi_reduction <add>, %61, %cst_24 [1] : vector<16x3xf32> to vector<16xf32>
    %63 = vector.shape_cast %62 : vector<16xf32> to vector<16x1xf32>
    %64 = tpu.reciprocal %63 : vector<16x1xf32> -> vector<16x1xf32>
    %65 = vector.broadcast %64 : vector<16x1xf32> to vector<16x3xf32>
    %66 = arith.mulf %61, %65 : vector<16x3xf32>
    %67 = vector.extract_strided_slice %21 {offsets = [0, 15], sizes = [16, 4], strides = [1, 1]} : vector<16x19xf32> to vector<16x4xf32>
    %cst_25 = arith.constant dense<0xFF800000> : vector<16xf32>
    %68 = vector.multi_reduction <maximumf>, %67, %cst_25 [1] : vector<16x4xf32> to vector<16xf32>
    %69 = vector.shape_cast %68 : vector<16xf32> to vector<16x1xf32>
    %70 = vector.broadcast %69 : vector<16x1xf32> to vector<16x4xf32>
    %71 = arith.subf %67, %70 : vector<16x4xf32>
    %72 = math.exp %71 : vector<16x4xf32>
    %cst_26 = arith.constant dense<0.000000e+00> : vector<16xf32>
    %73 = vector.multi_reduction <add>, %72, %cst_26 [1] : vector<16x4xf32> to vector<16xf32>
    %74 = vector.shape_cast %73 : vector<16xf32> to vector<16x1xf32>
    %75 = tpu.reciprocal %74 : vector<16x1xf32> -> vector<16x1xf32>
    %76 = vector.broadcast %75 : vector<16x1xf32> to vector<16x4xf32>
    %77 = arith.mulf %72, %76 : vector<16x4xf32>
    %78 = tpu.concatenate %22, %33, %44, %55, %66, %77 in 1 : vector<16x4xf32>, vector<16x2xf32>, vector<16x2xf32>, vector<16x4xf32>, vector<16x3xf32>, vector<16x4xf32> -> vector<16x19xf32>
    %c0_27 = arith.constant 0 : index
    %c0_28 = arith.constant 0 : index
    %79 = vector.load %arg8[%c0_27, %c0_28] : memref<16x19xf32, #tpu.memory_space<vmem>>, vector<16x19xf32>
    tpu.vector_store %arg8[%c0_27, %c0_28], %78 {strides = array<i32>} : memref<16x19xf32, #tpu.memory_space<vmem>>, vector<16x19xf32>,
    return
  }
  func.func @transform_0(%arg0: i32) -> (i32, i32) {
    %c0_i32 = arith.constant 0 : i32
    %c0_i32_0 = arith.constant 0 : i32
    return %arg0, %c0_i32 : i32, i32
  }
  func.func @transform_1(%arg0: i32) -> (i32, i32) {
    %c0_i32 = arith.constant 0 : i32
    %c0_i32_0 = arith.constant 0 : i32
    %c0_i32_1 = arith.constant 0 : i32
    return %c0_i32, %c0_i32_0 : i32, i32
  }
  func.func @transform_2(%arg0: i32) -> (i32, i32) {
    %c0_i32 = arith.constant 0 : i32
    %c0_i32_0 = arith.constant 0 : i32
    %c0_i32_1 = arith.constant 0 : i32
    return %c0_i32, %c0_i32_0 : i32, i32
  }
  func.func @transform_3(%arg0: i32) -> (i32, i32) {
    %c0_i32 = arith.constant 0 : i32
    %c0_i32_0 = arith.constant 0 : i32
    %c0_i32_1 = arith.constant 0 : i32
    return %c0_i32, %c0_i32_0 : i32, i32
  }
  func.func @transform_4(%arg0: i32) -> (i32, i32) {
    %c0_i32 = arith.constant 0 : i32
    %c0_i32_0 = arith.constant 0 : i32
    %c0_i32_1 = arith.constant 0 : i32
    return %c0_i32, %c0_i32_0 : i32, i32
  }
  func.func @transform_5(%arg0: i32) -> (i32, i32) {
    %c0_i32 = arith.constant 0 : i32
    %c0_i32_0 = arith.constant 0 : i32
    %c0_i32_1 = arith.constant 0 : i32
    return %c0_i32, %c0_i32_0 : i32, i32
  }
  func.func @transform_6(%arg0: i32) -> (i32, i32) {
    %c0_i32 = arith.constant 0 : i32
    %c0_i32_0 = arith.constant 0 : i32
    %c0_i32_1 = arith.constant 0 : i32
    return %c0_i32, %c0_i32_0 : i32, i32
  }
  func.func @transform_7(%arg0: i32) -> (i32, i32) {
    %c0_i32 = arith.constant 0 : i32
    %c0_i32_0 = arith.constant 0 : i32
    return %arg0, %c0_i32 : i32, i32
  }
}

</mosaic_0001>

<bundles_post_ra>
// kernel: multitask_forward.1
= control target key start
LH: loop header
LB: loop body
LE: loop exit
PB: predicated region body
PF: predicated region fallthrough
CT: control target
= control target key end

     0   :  { %v548_v0 = vmov 0.0   ;;  %vm549_vm0 = vmmov 0   ;;  %vm57_vm1 = vcmask 261120   ;;  %vm144_vm2 = vcmask 523264   ;;  %s553_s21 = smov 116   ;;  %s554_s22 = smov 113   ;;  %s732_s1 = inlined_call_operand.vmem [shape: bf16[32,64], index: 1, kind: input, shape index: {}]   ;;  %s733_s3 = inlined_call_operand.vmem [shape: bf16[64,32], index: 3, kind: input, shape index: {}]   ;;  %s734_s0 = inlined_call_operand.vmem [shape: bf16[16,32], index: 0, kind: input, shape index: {}]   ;;  %s735_s2 = inlined_call_operand.vmem [shape: f32[1,64], index: 2, kind: input, shape index: {}]   ;;  %s736_s5 = inlined_call_operand.vmem [shape: bf16[32,19], index: 5, kind: input, shape index: {}]   ;;  %s737_s4 = inlined_call_operand.vmem [shape: f32[1,32], index: 4, kind: input, shape index: {}]   ;;  %s738_s6 = inlined_call_operand.vmem [shape: f32[1,19], index: 6, kind: input, shape index: {}]   ;;  %s739_s7 = inlined_call_operand.vmem [shape: f32[16,19], index: 7, kind: output, shape index: {}]  }
   0x1   :  { %464 = vmatprep.subr.bf16.mxu0 %v548_v0  ;;  %v499_v1 = vld [vmem:[%s732_s1 + $0x8] sm:$0xff]   ;;  %468 = vmatprep.mubr.msk.bf16.mxu0 %vm549_vm0, %v548_v0  ;;  %v500_v2 = vld [vmem:[%s732_s1] sm:$0xff]   ;;  %v502_v3 = vld [vmem:[%s733_s3 + $0x18] sm:$0xff]   ;;  %vm291_vm3 = vcmask 64560   ;;  %vm259_vm4 = vcmask 48160   ;;  %vm322_vm5 = vcmask 97344  }
   0x2   :  { %472 = vmatprep.subr.bf16.mxu1 %v548_v0  ;;  %480 = vmatprep.mubr.msk.bf16.mxu1 %vm549_vm0, %v548_v0  ;;  %v501_v4 = vld [vmem:[%s734_s0] sm:$0xff]   ;;  %v503_v5 = vld [vmem:[%s733_s3 + $0x10] sm:$0xff]   ;;  %v504_v6 = vld [vmem:[%s733_s3 + $0x8] sm:$0xff]   ;;  %vm354_vm6 = vcmask 121952   ;;  %vm386_vm7 = vcmask 154744   ;;  %vm280_vm8 = vcmask 15360  }
   0x3   :  { %465 = vmatpush3.bf16.msra.mxu0 %v499_v1  ;;  %473 = vmatpush3.bf16.msra.mxu1 %v502_v3  ;;  %v505_v7 = vld [vmem:[%s733_s3] sm:$0xff]   ;;  %v506_v18 = vld [vmem:[%s736_s5 + $0x8] sm:$0xff]   ;;  %vm343_vm9 = vcmask 31744   ;;  %vm375_vm10 = vcmask 23552   ;;  %vm419_vm11 = vcmask 48128   ;;  %vm422_vm12 = vcmask 64512  }
   0x4   :  { %466 = vmatprep.subr.bf16.mxu0 %v548_v0  ;;  %474 = vmatprep.subr.bf16.mxu1 %v548_v0  ;;  %v438_v8 = vld [vmem:[%s735_s2] ss:$0 sm:$0xff]  ;;  %vm425_vm13 = vcmask 97280   ;;  %vm428_vm14 = vcmask 121856   ;;  %vm431_vm15 = vcmask 154624  }
   0x5   :  { %v507_v19 = vld [vmem:[%s736_s5] sm:$0xff]   ;;  %s551_s5 = smov 124  }
   0x6   :  { %v443_v20 = vld [vmem:[%s737_s4] ss:$0 sm:$0xff]  ;;  %s550_s4 = smov 122  }
   0x7   :  { %467 = vmatpush3.bf16.msra.mxu0 %v500_v2  ;;  %475 = vmatpush3.bf16.msra.mxu1 %v503_v5  ;;  %v449_v30 = vld [vmem:[%s738_s6] ss:$0 sm:$0xff]  ;;  %s552_s6 = smov 120  }
   0x8   :  { %484 = vmatprep.subr.bf16.mxu0 %v548_v0  ;;  %476 = vmatprep.subr.bf16.mxu1 %v548_v0 }
   0xa   :  { %469 = vmatmul.mubr.msk.bf16.vlgmr.msra.gmra.mxu0 %vm57_vm1, %v501_v4 }
   0xb   :  { %488 = vmatprep.mubr.msk.bf16.mxu0 %vm549_vm0, %v548_v0  ;;  %477 = vmatpush3.bf16.msra.mxu1 %v504_v6 }
   0xc   :  { %478 = vmatprep.subr.bf16.mxu1 %v548_v0  ;;  %485 = vmatpush3.bf16.msra.mxu0 %v506_v18 }
   0xd   :  { %486 = vmatprep.subr.bf16.mxu0 %v548_v0 }
   0xf   :  { %479 = vmatpush3.bf16.msra.mxu1 %v505_v7 }
  0x10   :  { %487 = vmatpush3.bf16.msra.mxu0 %v507_v19 }
  0xca   :  { %v95_v9 = vpop.f32.mrf.mxu0 }
  0xcb   :  { %v96_v11 = vadd.f32 %v438_v8, %v95_v9 }
  0xcc   :  { %v470_v10 = vpop.f32.mrf.mxu0 }
  0xcd   :  { %v102_v15 = vmax.f32 %v96_v11, 0.0 }
  0xce   :  { %v98_v12 = vpop.f32.mrf.mxu0 }
  0xcf   :  { %v99_v13 = vadd.f32 %v438_v8, %v98_v12 }
  0xd0   :  { %v471_v14 = vpop.f32.mrf.mxu0 }
  0xd1   :  { %v103_v16 = vmax.f32 %v99_v13, 0.0 }
  0xd3   :  { %v104_v17 = vpack.c.bf16 %v103_v16, %v102_v15 }
  0xd5   :  { %481 = vmatmul.mubr.msk.bf16.vlgmr.msra.gmra.mxu1 %vm144_vm2, %v104_v17 }
 0x195   :  { %v182_v21 = vpop.f32.mrf.mxu1 }
 0x196   :  { %v183_v23 = vadd.f32 %v443_v20, %v182_v21 }
 0x197   :  { %v482_v22 = vpop.f32.mrf.mxu1 }
 0x198   :  { %v189_v27 = vmax.f32 %v183_v23, 0.0 }
 0x199   :  { %v185_v24 = vpop.f32.mrf.mxu1 }
 0x19a   :  { %v186_v25 = vadd.f32 %v443_v20, %v185_v24 }
 0x19b   :  { %v483_v26 = vpop.f32.mrf.mxu1 }
 0x19c   :  { %v190_v28 = vmax.f32 %v186_v25, 0.0 }
 0x19e   :  { %v191_v29 = vpack.c.bf16 %v190_v28, %v189_v27 }
 0x1a0   :  { %489 = vmatmul.mubr.msk.bf16.vlgmr.msra.gmra.mxu0 %vm57_vm1, %v191_v29 }
 0x260   :  { %v252_v31 = vpop.f32.mrf.mxu0 }
 0x261   :  { %v636_v32 = vadd.f32 %v449_v30, %v252_v31 }
 0x262   :  { %v490_v33 = vpop.f32.mrf.mxu0 }
 0x263   :  { %v292_v34 = vsel %vm291_vm3, %v636_v32, -inf  ;;  %v260_v35 = vsel %vm259_vm4, %v636_v32, -inf  ;;  %v323_v39 = vsel %vm322_vm5, %v636_v32, -inf  ;;  %v355_v41 = vsel %vm354_vm6, %v636_v32, -inf }
 0x264   :  { %293 = vmax.xlane.f32.xlu1 %v292_v34  ;;  %261 = vmax.xlane.f32.xlu0 %v260_v35  ;;  %v255_v36 = vpop.f32.mrf.mxu0  ;;  %v387_v46 = vsel %vm386_vm7, %v636_v32, -inf }
 0x265   :  { %v641_v37 = vadd.f32 %v449_v30, %v255_v36 }
 0x266   :  { %v491_v38 = vpop.f32.mrf.mxu0 }
 0x267   :  { %v295_v40 = vsel %vm291_vm3, %v641_v37, -inf  ;;  %v326_v42 = vsel %vm322_vm5, %v641_v37, -inf  ;;  %v358_v43 = vsel %vm354_vm6, %v641_v37, -inf  ;;  %v263_v44 = vsel %vm259_vm4, %v641_v37, -inf }
 0x268   :  { %324 = vmax.xlane.f32.xlu0 %v323_v39  ;;  %296 = vmax.xlane.f32.xlu1 %v295_v40  ;;  %v390_v45 = vsel %vm386_vm7, %v641_v37, -inf }
 0x26c   :  { %356 = vmax.xlane.f32.xlu0 %v355_v41  ;;  %327 = vmax.xlane.f32.xlu1 %v326_v42 }
 0x270   :  { %359 = vmax.xlane.f32.xlu1 %v358_v43  ;;  %264 = vmax.xlane.f32.xlu0 %v263_v44 }
 0x274   :  { %391 = vmax.xlane.f32.xlu1 %v390_v45  ;;  %388 = vmax.xlane.f32.xlu0 %v387_v46 }
 0x2ed   :  { %v294_v47 = vpop.xlane.xlu1 %293  ;;  %v262_v48 = vpop.xlane.xlu0 %261 }
 0x2ee   :  { %v298_v49 = vsub.f32 %v636_v32, %v294_v47  ;;  %v266_v50 = vsub.f32 %v636_v32, %v262_v48 }
 0x2f0   :  { %v300_v51 = vmul.f32 1.442695, %v298_v49  ;;  %v268_v52 = vmul.f32 1.442695, %v266_v50 }
 0x2f1   :  { %v325_v53 = vpop.xlane.xlu0 %324  ;;  %v297_v55 = vpop.xlane.xlu1 %296 }
 0x2f2   :  { %508 = vpow2.f32 %v300_v51  ;;  %v329_v54 = vsub.f32 %v636_v32, %v325_v53  ;;  %v299_v62 = vsub.f32 %v641_v37, %v297_v55 }
 0x2f3   :  { %510 = vpow2.f32 %v268_v52 }
 0x2f4   :  { %v331_v56 = vmul.f32 1.442695, %v329_v54  ;;  %v302_v2 = vmul.f32 1.442695, %v299_v62 }
 0x2f5   :  { %v357_v57 = vpop.xlane.xlu0 %356  ;;  %v328_v60 = vpop.xlane.xlu1 %327 }
 0x2f6   :  { %512 = vpow2.f32 %v331_v56  ;;  %v361_v58 = vsub.f32 %v636_v32, %v357_v57  ;;  %v330_v6 = vsub.f32 %v641_v37, %v328_v60 }
 0x2f8   :  { %v363_v59 = vmul.f32 1.442695, %v361_v58  ;;  %v333_v10 = vmul.f32 1.442695, %v330_v6 }
 0x2f9   :  { %v265_v61 = vpop.xlane.xlu0 %264  ;;  %v360_v3 = vpop.xlane.xlu1 %359 }
 0x2fa   :  { %514 = vpow2.f32 %v363_v59  ;;  %v267_v63 = vsub.f32 %v641_v37, %v265_v61  ;;  %v362_v11 = vsub.f32 %v641_v37, %v360_v3 }
 0x2fc   :  { %v270_v0 = vmul.f32 1.442695, %v267_v63  ;;  %v365_v14 = vmul.f32 1.442695, %v362_v11 }
 0x2fd   :  { %v389_v1 = vpop.xlane.xlu0 %388  ;;  %v392_v12 = vpop.xlane.xlu1 %391 }
 0x2fe   :  { %v393_v4 = vsub.f32 %v636_v32, %v389_v1  ;;  %516 = vpow2.f32 %v270_v0  ;;  %v394_v15 = vsub.f32 %v641_v37, %v392_v12 }
 0x2ff   :  { %v659_v5 = vpop.eup %508  ;;  %518 = vpow2.f32 %v302_v2 }
 0x300   :  { %v662_v7 = vpop.eup %510  ;;  %v395_v8 = vmul.f32 1.442695, %v393_v4  ;;  %306 = vrot.lane.b32.xlu1 %v659_v5, %s550_s4  ;;  %v397_v16 = vmul.f32 1.442695, %v394_v15 }
 0x301   :  { %274 = vrot.lane.b32.xlu0 %v662_v7, %s551_s5 }
 0x302   :  { %520 = vpow2.f32 %v395_v8 }
 0x303   :  { %v666_v9 = vpop.eup %512  ;;  %522 = vpow2.f32 %v333_v10 }
 0x304   :  { %524 = vpow2.f32 %v365_v14 }
 0x305   :  { %337 = vrot.lane.b32.xlu0 %v666_v9, %s552_s6  ;;  %526 = vpow2.f32 %v397_v16 }
 0x307   :  { %v670_v13 = vpop.eup %514 }
 0x309   :  { %369 = vrot.lane.b32.xlu0 %v670_v13, %s553_s21 }
 0x30b   :  { %v674_v17 = vpop.eup %516 }
 0x30c   :  { %276 = vrot.lane.b32.xlu1 %v674_v17, %s551_s5  ;;  %v677_v18 = vpop.eup %518 }
 0x30f   :  { %v679_v19 = vpop.eup %520 }
 0x310   :  { %308 = vrot.lane.b32.xlu1 %v677_v18, %s550_s4  ;;  %401 = vrot.lane.b32.xlu0 %v679_v19, %s554_s22  ;;  %v683_v20 = vpop.eup %522 }
 0x311   :  { %v686_v21 = vpop.eup %524 }
 0x312   :  { %v689_v22 = vpop.eup %526 }
 0x314   :  { %339 = vrot.lane.b32.xlu1 %v683_v20, %s552_s6 }
 0x318   :  { %371 = vrot.lane.b32.xlu1 %v686_v21, %s553_s21 }
 0x31c   :  { %403 = vrot.lane.b32.xlu1 %v689_v22, %s554_s22 }
 0x372   :  { %v307_v25 = vpop.permute.xlu1 %306 }
 0x373   :  { %v275_v23 = vpop.permute.xlu0 %274  ;;  %v312_v27 = vsel %vm280_vm8, %v307_v25, 0.0 }
 0x374   :  { %v281_v24 = vsel %vm280_vm8, %v275_v23, 0.0 }
 0x375   :  { %282 = vadd.xlane.f32.xlu0 %v281_v24 }
 0x377   :  { %v338_v26 = vpop.permute.xlu0 %337 }
 0x378   :  { %v344_v28 = vsel %vm343_vm9, %v338_v26, 0.0 }
 0x379   :  { %313 = vadd.xlane.f32.xlu0 %v312_v27 }
 0x37b   :  { %v370_v29 = vpop.permute.xlu0 %369 }
 0x37c   :  { %v376_v33 = vsel %vm375_vm10, %v370_v29, 0.0 }
 0x37d   :  { %345 = vadd.xlane.f32.xlu0 %v344_v28 }
 0x37e   :  { %v277_v30 = vpop.permute.xlu1 %276 }
 0x37f   :  { %v284_v31 = vsel %vm280_vm8, %v277_v30, 0.0 }
 0x380   :  { %285 = vadd.xlane.f32.xlu1 %v284_v31 }
 0x381   :  { %377 = vadd.xlane.f32.xlu0 %v376_v33 }
 0x382   :  { %v309_v34 = vpop.permute.xlu1 %308  ;;  %v402_v36 = vpop.permute.xlu0 %401 }
 0x383   :  { %v315_v35 = vsel %vm280_vm8, %v309_v34, 0.0  ;;  %v407_v40 = vsel %vm343_vm9, %v402_v36, 0.0 }
 0x385   :  { %316 = vadd.xlane.f32.xlu0 %v315_v35 }
 0x386   :  { %v340_v38 = vpop.permute.xlu1 %339 }
 0x387   :  { %v347_v39 = vsel %vm343_vm9, %v340_v38, 0.0 }
 0x388   :  { %348 = vadd.xlane.f32.xlu1 %v347_v39 }
 0x389   :  { %408 = vadd.xlane.f32.xlu0 %v407_v40 }
 0x38a   :  { %v372_v41 = vpop.permute.xlu1 %371 }
 0x38b   :  { %v379_v42 = vsel %vm375_vm10, %v372_v41, 0.0 }
 0x38c   :  { %380 = vadd.xlane.f32.xlu1 %v379_v42 }
 0x38e   :  { %v404_v43 = vpop.permute.xlu1 %403 }
 0x38f   :  { %v410_v44 = vsel %vm343_vm9, %v404_v43, 0.0 }
 0x390   :  { %411 = vadd.xlane.f32.xlu1 %v410_v44 }
 0x3fe   :  { %v283_v45 = vpop.xlane.xlu0 %282 }
 0x3ff   :  { %528 = vrcp.f32 %v283_v45 }
 0x402   :  { %v314_v46 = vpop.xlane.xlu0 %313 }
 0x403   :  { %530 = vrcp.f32 %v314_v46 }
 0x406   :  { %v346_v47 = vpop.xlane.xlu0 %345 }
 0x407   :  { %532 = vrcp.f32 %v346_v47 }
 0x409   :  { %v286_v49 = vpop.xlane.xlu1 %285 }
 0x40a   :  { %v378_v48 = vpop.xlane.xlu0 %377 }
 0x40b   :  { %534 = vrcp.f32 %v378_v48 }
 0x40c   :  { %536 = vrcp.f32 %v286_v49  ;;  %v529_v54 = vpop.eup %528 }
 0x40d   :  { %v289_v59 = vmul.f32 %v529_v54, %v662_v7 }
 0x40e   :  { %v317_v50 = vpop.xlane.xlu0 %316 }
 0x40f   :  { %538 = vrcp.f32 %v317_v50  ;;  %v417_v1 = vsel %vm343_vm9, %v636_v32, %v289_v59 }
 0x410   :  { %v531_v55 = vpop.eup %530 }
 0x411   :  { %v349_v51 = vpop.xlane.xlu1 %348  ;;  %v320_v60 = vmul.f32 %v531_v55, %v659_v5 }
 0x412   :  { %v409_v52 = vpop.xlane.xlu0 %408 }
 0x413   :  { %540 = vrcp.f32 %v409_v52  ;;  %v420_v3 = vsel %vm419_vm11, %v417_v1, %v320_v60 }
 0x414   :  { %542 = vrcp.f32 %v349_v51  ;;  %v533_v57 = vpop.eup %532 }
 0x415   :  { %v381_v53 = vpop.xlane.xlu1 %380  ;;  %v352_v61 = vmul.f32 %v533_v57, %v666_v9 }
 0x416   :  { %544 = vrcp.f32 %v381_v53 }
 0x417   :  { %v423_v6 = vsel %vm422_vm12, %v420_v3, %v352_v61 }
 0x418   :  { %v535_v58 = vpop.eup %534 }
 0x419   :  { %v412_v56 = vpop.xlane.xlu1 %411  ;;  %v537_v62 = vpop.eup %536  ;;  %v384_v63 = vmul.f32 %v535_v58, %v670_v13 }
 0x41a   :  { %546 = vrcp.f32 %v412_v56  ;;  %v290_v7 = vmul.f32 %v537_v62, %v674_v17 }
 0x41b   :  { %v426_v8 = vsel %vm425_vm13, %v423_v6, %v384_v63 }
 0x41c   :  { %v539_v0 = vpop.eup %538  ;;  %v418_v13 = vsel %vm343_vm9, %v641_v37, %v290_v7 }
 0x41d   :  { %v321_v10 = vmul.f32 %v539_v0, %v677_v18 }
 0x41f   :  { %v421_v15 = vsel %vm419_vm11, %v418_v13, %v321_v10 }
 0x420   :  { %v541_v2 = vpop.eup %540 }
 0x421   :  { %v543_v4 = vpop.eup %542  ;;  %v415_v5 = vmul.f32 %v541_v2, %v679_v19 }
 0x422   :  { %v353_v11 = vmul.f32 %v543_v4, %v683_v20 }
 0x423   :  { %v545_v9 = vpop.eup %544  ;;  %v429_v32 = vsel %vm428_vm14, %v426_v8, %v415_v5 }
 0x424   :  { %432 = vst.msk [vmem:[%s739_s7] sm:$0xff] %vm431_vm15, %v429_v32  ;;  %v385_v12 = vmul.f32 %v545_v9, %v686_v21  ;;  %v424_v16 = vsel %vm422_vm12, %v421_v15, %v353_v11 }
 0x426   :  { %v427_v18 = vsel %vm425_vm13, %v424_v16, %v385_v12 }
 0x427   :  { %v547_v14 = vpop.eup %546 }
 0x428   :  { %v416_v17 = vmul.f32 %v547_v14, %v689_v22 }
 0x42a   :  { %v430_v19 = vsel %vm428_vm14, %v427_v18, %v416_v17 }
 0x42b   :  { %433 = vst.msk [vmem:[%s739_s7 + $0x8] sm:$0xff] %vm431_vm15, %v430_v19 }

</bundles_post_ra>
